<compile_context>
chip_gen: v6e
topology: v6e:2x2x1
jax: 0.10.0
libtpu: 0.0.40
codegen_flags: <defaults>
</compile_context>

<pallas_src>
import functools

import jax
import jax.numpy as jnp
from jax.experimental import pallas as pl
from jax.experimental.pallas import tpu as pltpu


def _sum_all(a):
    # Full reduce to a (1, 1) tile without ever creating a rank-0 value
    # (lane reduce on the XLU, then sublane reduce).
    return jnp.sum(jnp.sum(a, axis=1, keepdims=True), axis=0, keepdims=True)


def vae_kernel(latent_dim,
               x_ref, eps_ref,
               w1_ref, b1_ref, wh_ref, bh_ref,
               wp1_ref, bp1_ref, wp2_ref, bp2_ref,
               l1_ref, l2_ref):
    # ----- init the scalar accumulators on the first batch tile -----
    @pl.when(pl.program_id(0) == 0)
    def _():
        l1_ref[...] = jnp.zeros_like(l1_ref)
        l2_ref[...] = jnp.zeros_like(l2_ref)

    x = x_ref[...]                    # (TB, input_dim), kept f32 for the loss
    mxu = w1_ref.dtype                # matmul operand dtype (f32, or bf16 on v6e/v7x)

    # ----- Q encoder: h = ReLU(x W1 + b1) -----
    h = jnp.dot(x.astype(mxu), w1_ref[...],
                preferred_element_type=jnp.float32) + b1_ref[...]
    h = jnp.maximum(h, 0.0)

    # ----- fused heads: [mu_z | log_sigma2_z] = h Wh + bh  (one MXU push) -----
    head = jnp.dot(h.astype(mxu), wh_ref[...],
                   preferred_element_type=jnp.float32) + bh_ref[...]
    mu_z = head[:, :latent_dim]
    log_sigma2_z = head[:, latent_dim:]

    # ----- reparameterization: z = mu + exp(0.5 * log_sigma2) * eps -----
    sigma_z = jnp.exp(0.5 * log_sigma2_z)          # EUP; off the VALU slots
    z = mu_z + sigma_z * eps_ref[...]

    # ----- P decoder: mu_x = sigmoid(ReLU(z Wp1 + bp1) Wp2 + bp2) -----
    hp = jnp.dot(z.astype(mxu), wp1_ref[...],
                 preferred_element_type=jnp.float32) + bp1_ref[...]
    hp = jnp.maximum(hp, 0.0)
    logits = jnp.dot(hp.astype(mxu), wp2_ref[...],
                     preferred_element_type=jnp.float32) + bp2_ref[...]
    mu_x = jax.nn.sigmoid(logits)

    # ----- ELBO terms: accumulate per-tile partial sums (f32 epilogue) -----
    l1_ref[...] += -0.5 * _sum_all((x - mu_x) ** 2)
    l2_ref[...] += 0.5 * _sum_all(1.0 + log_sigma2_z - mu_z ** 2 - sigma_z ** 2)


def _pick_batch_tile(batch, max_tile=256):
    """Largest multiple-of-8 batch tile <= max_tile that divides `batch`."""
    if batch <= max_tile:
        return batch
    for tb in range(max_tile, 0, -8):
        if batch % tb == 0:
            return tb
    return batch


@functools.partial(jax.jit, static_argnames=("mxu_dtype", "batch_tile"))
def vae_forward(x, eps, params, *, mxu_dtype=jnp.float32, batch_tile=None):
    """VAE forward. Returns (elbo, l1, l2) exactly like the PyTorch module.

    params = (w1, b1, wmu, bmu, wls, bls, wp1, bp1, wp2, bp2).
    """
    w1, b1, wmu, bmu, wls, bls, wp1, bp1, wp2, bp2 = params
    batch, input_dim = x.shape
    latent_dim = wmu.shape[1]

    # Fuse the two Q heads into a single matmul.
    wh = jnp.concatenate([wmu, wls], axis=1)     # (hidden, 2*latent)
    bh = jnp.concatenate([bmu, bls], axis=1)     # (1, 2*latent)

    # v6e/v7x: bf16 matmul operands (f32 accumulate + f32 bias/ReLU/exp/sigmoid).
    # Default stays f32 so the toy-size correctness check is tight; pass
    # mxu_dtype=jnp.bfloat16 for production shapes. Biases stay f32 (v5e VPU).
    w1c, whc, wp1c, wp2c = (w.astype(mxu_dtype) for w in (w1, wh, wp1, wp2))

    tb = batch_tile or _pick_batch_tile(batch)
    assert batch % tb == 0, "batch must be divisible by the batch tile"
    nb = batch // tb
    # Working set here is a few KB; for scaled-up hidden/batch re-derive the
    # tile against v7x's 64 MiB VMEM (vs 128 MiB on v5e/v6e) or set
    # vmem_limit_bytes in CompilerParams.

    # Weights/biases: constant block index -> DMA'd once, VMEM-resident.
    resident = lambda a: pl.BlockSpec(a.shape, lambda i: (0, 0))

    kernel = functools.partial(vae_kernel, latent_dim)

    l1, l2 = pl.pallas_call(
        kernel,
        out_shape=(
            jax.ShapeDtypeStruct((1, 1), jnp.float32),
            jax.ShapeDtypeStruct((1, 1), jnp.float32),
        ),
        grid=(nb,),
        in_specs=[
            pl.BlockSpec((tb, input_dim), lambda i: (i, 0)),    # x tile
            pl.BlockSpec((tb, latent_dim), lambda i: (i, 0)),   # eps tile
            resident(w1c), resident(b1),
            resident(whc), resident(bh),
            resident(wp1c), resident(bp1),
            resident(wp2c), resident(bp2),
        ],
        out_specs=(
            pl.BlockSpec((1, 1), lambda i: (0, 0)),
            pl.BlockSpec((1, 1), lambda i: (0, 0)),
        ),
        # The batch axis is a reduction into the scalar ELBO accumulators, so it
        # must be "arbitrary" ("parallel"/megacore would require per-tile partial
        # outputs plus a wrapper-side sum; not worth it for scalar outputs).
        compiler_params=pltpu.CompilerParams(
            dimension_semantics=("arbitrary",)),
    )(x, eps, w1c, b1, whc, bh, wp1c, bp1, wp2c, bp2)

    l1 = l1[0, 0]
    l2 = l2[0, 0]
    return l1 + l2, l1, l2


def init_params(key, input_dim, hidden_dim, latent_dim, dtype=jnp.float32):
    """Deterministic param init (PyTorch-Linear-like uniform fan-in scaling)."""
    ks = jax.random.split(key, 10)

    def linear(kw, kb, fan_in, fan_out):
        bound = 1.0 / (fan_in ** 0.5)
        w = jax.random.uniform(kw, (fan_in, fan_out), dtype, -bound, bound)
        b = jax.random.uniform(kb, (1, fan_out), dtype, -bound, bound)
        return w, b

    w1, b1 = linear(ks[0], ks[1], input_dim, hidden_dim)      # q.hidden[0]
    wmu, bmu = linear(ks[2], ks[3], hidden_dim, latent_dim)   # q.mu
    wls, bls = linear(ks[4], ks[5], hidden_dim, latent_dim)   # q.log_sigma2
    wp1, bp1 = linear(ks[6], ks[7], latent_dim, hidden_dim)   # p.mu[0]
    wp2, bp2 = linear(ks[8], ks[9], hidden_dim, input_dim)    # p.mu[2]
    return w1, b1, wmu, bmu, wls, bls, wp1, bp1, wp2, bp2


def vae_reference(x, eps, params):
    """Plain-JAX reference, same math as the PyTorch VAE.forward."""
    w1, b1, wmu, bmu, wls, bls, wp1, bp1, wp2, bp2 = params
    h = jnp.maximum(x @ w1 + b1, 0.0)
    mu_z = h @ wmu + bmu
    log_sigma2_z = h @ wls + bls
    sigma_z = jnp.exp(0.5 * log_sigma2_z)
    z = mu_z + sigma_z * eps
    hp = jnp.maximum(z @ wp1 + bp1, 0.0)
    mu_x = jax.nn.sigmoid(hp @ wp2 + bp2)
    l1 = -0.5 * jnp.sum((x - mu_x) ** 2)
    l2 = 0.5 * jnp.sum(1.0 + log_sigma2_z - mu_z ** 2 - sigma_z ** 2)
    return l1 + l2, l1, l2


if __name__ == "__main__":
    input_dim, hidden_dim, latent_dim = 32, 64, 16
    batch = 64          # small, but with batch_tile=32 it exercises the
    batch_tile = 32     # 2-step grid + cross-tile scalar accumulation path

    key = jax.random.PRNGKey(0)
    kx, keps, kp = jax.random.split(key, 3)
    x = jax.random.normal(kx, (batch, input_dim), jnp.float32)
    # torch.randn_like(sigma_z): the standard-normal noise is generated in the
    # wrapper (deterministically) and passed to the kernel as an explicit input.
    eps = jax.random.normal(keps, (batch, latent_dim), jnp.float32)
    params = init_params(kp, input_dim, hidden_dim, latent_dim)

    elbo, l1, l2 = vae_forward(x, eps, params, batch_tile=batch_tile)
    jax.block_until_ready((elbo, l1, l2))

    elbo_r, l1_r, l2_r = vae_reference(x, eps, params)
    ok = (jnp.allclose(l1, l1_r, rtol=1e-3, atol=1e-2)
          and jnp.allclose(l2, l2_r, rtol=1e-3, atol=1e-2)
          and jnp.allclose(elbo, elbo_r, rtol=1e-3, atol=1e-2))
    assert ok, (f"mismatch: kernel=({float(elbo)}, {float(l1)}, {float(l2)}) "
                f"ref=({float(elbo_r)}, {float(l1_r)}, {float(l2_r)})")

    print("KERNEL_OK")
</pallas_src>

<mosaic_0001>
module attributes {stable_mosaic.version = 11 : i64} {
  func.func @vae_kernel(%arg0: i32, %arg1: memref<32x32xf32, #tpu.memory_space<vmem>>, %arg2: memref<32x16xf32, #tpu.memory_space<vmem>>, %arg3: memref<32x64xf32, #tpu.memory_space<vmem>>, %arg4: memref<1x64xf32, #tpu.memory_space<vmem>>, %arg5: memref<64x32xf32, #tpu.memory_space<vmem>>, %arg6: memref<1x32xf32, #tpu.memory_space<vmem>>, %arg7: memref<16x64xf32, #tpu.memory_space<vmem>>, %arg8: memref<1x64xf32, #tpu.memory_space<vmem>>, %arg9: memref<64x32xf32, #tpu.memory_space<vmem>>, %arg10: memref<1x32xf32, #tpu.memory_space<vmem>>, %arg11: memref<1x1xf32, #tpu.memory_space<vmem>>, %arg12: memref<1x1xf32, #tpu.memory_space<vmem>>) attributes {dimension_semantics = [#tpu.dimension_semantics<arbitrary>], iteration_bounds = array<i64: 2>, scalar_prefetch = 0 : i64, scratch_operands = 0 : i64, tpu.core_type = #tpu.core_type<tc>, window_params = [{transform_indices = @transform_0, window_bounds = array<i64: 32, 32>}, {transform_indices = @transform_1, window_bounds = array<i64: 32, 16>}, {pipeline_mode = #tpu.pipeline_mode<synchronous>, transform_indices = @transform_2, window_bounds = array<i64: 32, 64>}, {pipeline_mode = #tpu.pipeline_mode<synchronous>, transform_indices = @transform_3, window_bounds = array<i64: 1, 64>}, {pipeline_mode = #tpu.pipeline_mode<synchronous>, transform_indices = @transform_4, window_bounds = array<i64: 64, 32>}, {pipeline_mode = #tpu.pipeline_mode<synchronous>, transform_indices = @transform_5, window_bounds = array<i64: 1, 32>}, {pipeline_mode = #tpu.pipeline_mode<synchronous>, transform_indices = @transform_6, window_bounds = array<i64: 16, 64>}, {pipeline_mode = #tpu.pipeline_mode<synchronous>, transform_indices = @transform_7, window_bounds = array<i64: 1, 64>}, {pipeline_mode = #tpu.pipeline_mode<synchronous>, transform_indices = @transform_8, window_bounds = array<i64: 64, 32>}, {pipeline_mode = #tpu.pipeline_mode<synchronous>, transform_indices = @transform_9, window_bounds = array<i64: 1, 32>}, {pipeline_mode = #tpu.pipeline_mode<synchronous>, transform_indices = @transform_10, window_bounds = array<i64: 1, 1>}, {pipeline_mode = #tpu.pipeline_mode<synchronous>, transform_indices = @transform_11, window_bounds = array<i64: 1, 1>}]} {
    %c0_i32 = arith.constant 0 : i32
    %0 = arith.cmpi eq, %arg0, %c0_i32 : i32
    %1 = arith.extui %0 : i1 to i32
    %c0_i32_0 = arith.constant 0 : i32
    %2 = arith.cmpi ne, %1, %c0_i32_0 : i32
    scf.if %2 {
      %cst_42 = arith.constant 0.000000e+00 : f32
      %67 = vector.broadcast %cst_42 : f32 to vector<1x1xf32>
      %c0_43 = arith.constant 0 : index
      %c0_44 = arith.constant 0 : index
      %68 = vector.load %arg11[%c0_43, %c0_44] : memref<1x1xf32, #tpu.memory_space<vmem>>, vector<1x1xf32>
      tpu.vector_store %arg11[%c0_43, %c0_44], %67 {strides = array<i32>} : memref<1x1xf32, #tpu.memory_space<vmem>>, vector<1x1xf32>,
      %cst_45 = arith.constant 0.000000e+00 : f32
      %69 = vector.broadcast %cst_45 : f32 to vector<1x1xf32>
      %c0_46 = arith.constant 0 : index
      %c0_47 = arith.constant 0 : index
      %70 = vector.load %arg12[%c0_46, %c0_47] : memref<1x1xf32, #tpu.memory_space<vmem>>, vector<1x1xf32>
      tpu.vector_store %arg12[%c0_46, %c0_47], %69 {strides = array<i32>} : memref<1x1xf32, #tpu.memory_space<vmem>>, vector<1x1xf32>,
    } else {
    }
    %c0 = arith.constant 0 : index
    %c0_1 = arith.constant 0 : index
    %3 = vector.load %arg1[%c0, %c0_1] : memref<32x32xf32, #tpu.memory_space<vmem>>, vector<32x32xf32>
    %c0_2 = arith.constant 0 : index
    %c0_3 = arith.constant 0 : index
    %4 = vector.load %arg3[%c0_2, %c0_3] : memref<32x64xf32, #tpu.memory_space<vmem>>, vector<32x64xf32>
    %cst = arith.constant dense<0.000000e+00> : vector<32x64xf32>
    %5 = tpu.matmul %3, %4, %cst {dimension_numbers = #tpu.dot_dimension_numbers<[1], [0], [0], [1], [0, 0, 1, 1], [], []>} : vector<32x32xf32>, vector<32x64xf32>, vector<32x64xf32> -> vector<32x64xf32>
    %c0_4 = arith.constant 0 : index
    %c0_5 = arith.constant 0 : index
    %6 = vector.load %arg4[%c0_4, %c0_5] : memref<1x64xf32, #tpu.memory_space<vmem>>, vector<1x64xf32>
    %7 = vector.broadcast %6 : vector<1x64xf32> to vector<32x64xf32>
    %8 = arith.addf %5, %7 : vector<32x64xf32>
    %cst_6 = arith.constant 0.000000e+00 : f32
    %9 = vector.broadcast %cst_6 : f32 to vector<32x64xf32>
    %10 = arith.maximumf %8, %9 : vector<32x64xf32>
    %c0_7 = arith.constant 0 : index
    %c0_8 = arith.constant 0 : index
    %11 = vector.load %arg5[%c0_7, %c0_8] : memref<64x32xf32, #tpu.memory_space<vmem>>, vector<64x32xf32>
    %cst_9 = arith.constant dense<0.000000e+00> : vector<32x32xf32>
    %12 = tpu.matmul %10, %11, %cst_9 {dimension_numbers = #tpu.dot_dimension_numbers<[1], [0], [0], [1], [0, 0, 1, 1], [], []>} : vector<32x64xf32>, vector<64x32xf32>, vector<32x32xf32> -> vector<32x32xf32>
    %c0_10 = arith.constant 0 : index
    %c0_11 = arith.constant 0 : index
    %13 = vector.load %arg6[%c0_10, %c0_11] : memref<1x32xf32, #tpu.memory_space<vmem>>, vector<1x32xf32>
    %14 = vector.broadcast %13 : vector<1x32xf32> to vector<32x32xf32>
    %15 = arith.addf %12, %14 : vector<32x32xf32>
    %16 = vector.extract_strided_slice %15 {offsets = [0, 0], sizes = [32, 16], strides = [1, 1]} : vector<32x32xf32> to vector<32x16xf32>
    %17 = vector.extract_strided_slice %15 {offsets = [0, 16], sizes = [32, 16], strides = [1, 1]} : vector<32x32xf32> to vector<32x16xf32>
    %cst_12 = arith.constant 5.000000e-01 : f32
    %18 = vector.broadcast %cst_12 : f32 to vector<32x16xf32>
    %19 = arith.mulf %18, %17 : vector<32x16xf32>
    %20 = math.exp %19 : vector<32x16xf32>
    %c0_13 = arith.constant 0 : index
    %c0_14 = arith.constant 0 : index
    %21 = vector.load %arg2[%c0_13, %c0_14] : memref<32x16xf32, #tpu.memory_space<vmem>>, vector<32x16xf32>
    %22 = arith.mulf %20, %21 : vector<32x16xf32>
    %23 = arith.addf %16, %22 : vector<32x16xf32>
    %c0_15 = arith.constant 0 : index
    %c0_16 = arith.constant 0 : index
    %24 = vector.load %arg7[%c0_15, %c0_16] : memref<16x64xf32, #tpu.memory_space<vmem>>, vector<16x64xf32>
    %cst_17 = arith.constant dense<0.000000e+00> : vector<32x64xf32>
    %25 = tpu.matmul %23, %24, %cst_17 {dimension_numbers = #tpu.dot_dimension_numbers<[1], [0], [0], [1], [0, 0, 1, 1], [], []>} : vector<32x16xf32>, vector<16x64xf32>, vector<32x64xf32> -> vector<32x64xf32>
    %c0_18 = arith.constant 0 : index
    %c0_19 = arith.constant 0 : index
    %26 = vector.load %arg8[%c0_18, %c0_19] : memref<1x64xf32, #tpu.memory_space<vmem>>, vector<1x64xf32>
    %27 = vector.broadcast %26 : vector<1x64xf32> to vector<32x64xf32>
    %28 = arith.addf %25, %27 : vector<32x64xf32>
    %cst_20 = arith.constant 0.000000e+00 : f32
    %29 = vector.broadcast %cst_20 : f32 to vector<32x64xf32>
    %30 = arith.maximumf %28, %29 : vector<32x64xf32>
    %c0_21 = arith.constant 0 : index
    %c0_22 = arith.constant 0 : index
    %31 = vector.load %arg9[%c0_21, %c0_22] : memref<64x32xf32, #tpu.memory_space<vmem>>, vector<64x32xf32>
    %cst_23 = arith.constant dense<0.000000e+00> : vector<32x32xf32>
    %32 = tpu.matmul %30, %31, %cst_23 {dimension_numbers = #tpu.dot_dimension_numbers<[1], [0], [0], [1], [0, 0, 1, 1], [], []>} : vector<32x64xf32>, vector<64x32xf32>, vector<32x32xf32> -> vector<32x32xf32>
    %c0_24 = arith.constant 0 : index
    %c0_25 = arith.constant 0 : index
    %33 = vector.load %arg10[%c0_24, %c0_25] : memref<1x32xf32, #tpu.memory_space<vmem>>, vector<1x32xf32>
    %34 = vector.broadcast %33 : vector<1x32xf32> to vector<32x32xf32>
    %35 = arith.addf %32, %34 : vector<32x32xf32>
    %36 = arith.negf %35 : vector<32x32xf32>
    %37 = math.exp %36 : vector<32x32xf32>
    %cst_26 = arith.constant 1.000000e+00 : f32
    %38 = vector.broadcast %cst_26 : f32 to vector<32x32xf32>
    %39 = arith.addf %38, %37 : vector<32x32xf32>
    %40 = arith.divf %38, %39 : vector<32x32xf32>
    %c0_27 = arith.constant 0 : index
    %c0_28 = arith.constant 0 : index
    %41 = vector.load %arg11[%c0_27, %c0_28] : memref<1x1xf32, #tpu.memory_space<vmem>>, vector<1x1xf32>
    %42 = arith.subf %3, %40 : vector<32x32xf32>
    %43 = arith.mulf %42, %42 : vector<32x32xf32>
    %cst_29 = arith.constant dense<0.000000e+00> : vector<32xf32>
    %44 = vector.multi_reduction <add>, %43, %cst_29 [1] : vector<32x32xf32> to vector<32xf32>
    %45 = vector.shape_cast %44 : vector<32xf32> to vector<32x1xf32>
    %cst_30 = arith.constant dense<0.000000e+00> : vector<1xf32>
    %46 = vector.multi_reduction <add>, %45, %cst_30 [0] : vector<32x1xf32> to vector<1xf32>
    %47 = vector.shape_cast %46 : vector<1xf32> to vector<1x1xf32>
    %cst_31 = arith.constant -5.000000e-01 : f32
    %48 = vector.broadcast %cst_31 : f32 to vector<1x1xf32>
    %49 = arith.mulf %48, %47 : vector<1x1xf32>
    %50 = arith.addf %41, %49 : vector<1x1xf32>
    %c0_32 = arith.constant 0 : index
    %c0_33 = arith.constant 0 : index
    %51 = vector.load %arg11[%c0_32, %c0_33] : memref<1x1xf32, #tpu.memory_space<vmem>>, vector<1x1xf32>
    tpu.vector_store %arg11[%c0_32, %c0_33], %50 {strides = array<i32>} : memref<1x1xf32, #tpu.memory_space<vmem>>, vector<1x1xf32>,
    %c0_34 = arith.constant 0 : index
    %c0_35 = arith.constant 0 : index
    %52 = vector.load %arg12[%c0_34, %c0_35] : memref<1x1xf32, #tpu.memory_space<vmem>>, vector<1x1xf32>
    %cst_36 = arith.constant 1.000000e+00 : f32
    %53 = vector.broadcast %cst_36 : f32 to vector<32x16xf32>
    %54 = arith.addf %53, %17 : vector<32x16xf32>
    %55 = arith.mulf %16, %16 : vector<32x16xf32>
    %56 = arith.subf %54, %55 : vector<32x16xf32>
    %57 = arith.mulf %20, %20 : vector<32x16xf32>
    %58 = arith.subf %56, %57 : vector<32x16xf32>
    %cst_37 = arith.constant dense<0.000000e+00> : vector<32xf32>
    %59 = vector.multi_reduction <add>, %58, %cst_37 [1] : vector<32x16xf32> to vector<32xf32>
    %60 = vector.shape_cast %59 : vector<32xf32> to vector<32x1xf32>
    %cst_38 = arith.constant dense<0.000000e+00> : vector<1xf32>
    %61 = vector.multi_reduction <add>, %60, %cst_38 [0] : vector<32x1xf32> to vector<1xf32>
    %62 = vector.shape_cast %61 : vector<1xf32> to vector<1x1xf32>
    %cst_39 = arith.constant 5.000000e-01 : f32
    %63 = vector.broadcast %cst_39 : f32 to vector<1x1xf32>
    %64 = arith.mulf %63, %62 : vector<1x1xf32>
    %65 = arith.addf %52, %64 : vector<1x1xf32>
    %c0_40 = arith.constant 0 : index
    %c0_41 = arith.constant 0 : index
    %66 = vector.load %arg12[%c0_40, %c0_41] : memref<1x1xf32, #tpu.memory_space<vmem>>, vector<1x1xf32>
    tpu.vector_store %arg12[%c0_40, %c0_41], %65 {strides = array<i32>} : memref<1x1xf32, #tpu.memory_space<vmem>>, vector<1x1xf32>,
    return
  }
  func.func @transform_0(%arg0: i32) -> (i32, i32) {
    %c0_i32 = arith.constant 0 : i32
    %c0_i32_0 = arith.constant 0 : i32
    return %arg0, %c0_i32 : i32, i32
  }
  func.func @transform_1(%arg0: i32) -> (i32, i32) {
    %c0_i32 = arith.constant 0 : i32
    %c0_i32_0 = arith.constant 0 : i32
    return %arg0, %c0_i32 : i32, i32
  }
  func.func @transform_2(%arg0: i32) -> (i32, i32) {
    %c0_i32 = arith.constant 0 : i32
    %c0_i32_0 = arith.constant 0 : i32
    %c0_i32_1 = arith.constant 0 : i32
    return %c0_i32, %c0_i32_0 : i32, i32
  }
  func.func @transform_3(%arg0: i32) -> (i32, i32) {
    %c0_i32 = arith.constant 0 : i32
    %c0_i32_0 = arith.constant 0 : i32
    %c0_i32_1 = arith.constant 0 : i32
    return %c0_i32, %c0_i32_0 : i32, i32
  }
  func.func @transform_4(%arg0: i32) -> (i32, i32) {
    %c0_i32 = arith.constant 0 : i32
    %c0_i32_0 = arith.constant 0 : i32
    %c0_i32_1 = arith.constant 0 : i32
    return %c0_i32, %c0_i32_0 : i32, i32
  }
  func.func @transform_5(%arg0: i32) -> (i32, i32) {
    %c0_i32 = arith.constant 0 : i32
    %c0_i32_0 = arith.constant 0 : i32
    %c0_i32_1 = arith.constant 0 : i32
    return %c0_i32, %c0_i32_0 : i32, i32
  }
  func.func @transform_6(%arg0: i32) -> (i32, i32) {
    %c0_i32 = arith.constant 0 : i32
    %c0_i32_0 = arith.constant 0 : i32
    %c0_i32_1 = arith.constant 0 : i32
    return %c0_i32, %c0_i32_0 : i32, i32
  }
  func.func @transform_7(%arg0: i32) -> (i32, i32) {
    %c0_i32 = arith.constant 0 : i32
    %c0_i32_0 = arith.constant 0 : i32
    %c0_i32_1 = arith.constant 0 : i32
    return %c0_i32, %c0_i32_0 : i32, i32
  }
  func.func @transform_8(%arg0: i32) -> (i32, i32) {
    %c0_i32 = arith.constant 0 : i32
    %c0_i32_0 = arith.constant 0 : i32
    %c0_i32_1 = arith.constant 0 : i32
    return %c0_i32, %c0_i32_0 : i32, i32
  }
  func.func @transform_9(%arg0: i32) -> (i32, i32) {
    %c0_i32 = arith.constant 0 : i32
    %c0_i32_0 = arith.constant 0 : i32
    %c0_i32_1 = arith.constant 0 : i32
    return %c0_i32, %c0_i32_0 : i32, i32
  }
  func.func @transform_10(%arg0: i32) -> (i32, i32) {
    %c0_i32 = arith.constant 0 : i32
    %c0_i32_0 = arith.constant 0 : i32
    %c0_i32_1 = arith.constant 0 : i32
    return %c0_i32, %c0_i32_0 : i32, i32
  }
  func.func @transform_11(%arg0: i32) -> (i32, i32) {
    %c0_i32 = arith.constant 0 : i32
    %c0_i32_0 = arith.constant 0 : i32
    %c0_i32_1 = arith.constant 0 : i32
    return %c0_i32, %c0_i32_0 : i32, i32
  }
}

</mosaic_0001>

<bundles_post_ra>
// kernel: vae_forward.1
= control target key start
LH: loop header
LB: loop body
LE: loop exit
PB: predicated region body
PF: predicated region fallthrough
CT: control target
= control target key end

     0   :  { %17 = vsyncpa [#allocation3], 0  ;;  %s1663_s0 = inlined_call_operand.vmem [shape: f32[64,32], index: 0, kind: input, shape index: {}]   ;;  %s1664_s1 = inlined_call_operand.vmem [shape: f32[64,16], index: 1, kind: input, shape index: {}]   ;;  %s1665_s2 = inlined_call_operand.vmem [shape: f32[32,64], index: 2, kind: input, shape index: {}]   ;;  %s1666_s3 = inlined_call_operand.vmem [shape: f32[1,64], index: 3, kind: input, shape index: {}]   ;;  %s1667_s4 = inlined_call_operand.vmem [shape: f32[64,32], index: 4, kind: input, shape index: {}]   ;;  %s1668_s5 = inlined_call_operand.vmem [shape: f32[1,32], index: 5, kind: input, shape index: {}]   ;;  %s1669_s6 = inlined_call_operand.vmem [shape: f32[16,64], index: 6, kind: input, shape index: {}]   ;;  %s1670_s7 = inlined_call_operand.vmem [shape: f32[1,64], index: 7, kind: input, shape index: {}]   ;;  %s1671_s8 = inlined_call_operand.vmem [shape: f32[64,32], index: 8, kind: input, shape index: {}]   ;;  %s1672_s9 = inlined_call_operand.vmem [shape: f32[1,32], index: 9, kind: input, shape index: {}]   ;;  %s1673_s10 = inlined_call_operand.hbm [shape: f32[1,1], index: 10, kind: output, shape index: {0}]   ;;  %s1674_s11 = inlined_call_operand.hbm [shape: f32[1,1], index: 11, kind: output, shape index: {1}]  }
   0x1   :  { %18 = vsyncpa [#allocation5], 0  ;;  %s1450_s17 = smov 0  }
   0x2 LB: > { %s1456_s18 = sadd.s32 4294967295, %s1383_s17   ;;  %p1130_p0 = scmp.ge.s32.totalorder %s1383_s17, 1  ;;  %s1383_s17 = sphi %s1450_s17, %s24_s17  }
   0x3   : > { %p344_p1 = scmp.lt.s32.totalorder %s1383_s17, 3 }
   0x5   : > { %p345_p2 = pnand %p1130_p0, %p344_p1 }
   0x6   : > { %s1131_s19 = sshll.u32 (!%p345_p2), %s1456_s18, 2  ;;  %p1135_p4 = scmp.ne.s32.totalorder (!%p345_p2), %s1456_s18, 0 }
   0x7   : > { %348 = sbr.rel (%p345_p2) target bundleno = 1175 (0x497), region = 60  ;;  %p385_p3 = scmp.lt.s32.totalorder (!%p345_p2), %s1131_s19, 7 }
   0xc   : > { %s1676_s19 = smov (!%p385_p3, %s1131_s19), 7  ;;  %399 = sbr.rel (%p1135_p4) target bundleno = 19 (0x13), region = 64 }
   0xd   : > { %s1132_s20 = sshll.u32 %s1676_s19, 3 }
   0xe   : > { %s1464_s23 = scalar_lea.vmem %s1663_s0, %s1132_s20  ;;  %s1469_s26 = scalar_lea.vmem %s1664_s1, %s1132_s20 }
  0x11   : > { %vm400_vm0 = vcmask 0   ;;  %v1385_v0 = vmov 0.0  }
  0x12   : > { %401 = vst.msk [vmem:[#allocation2] sm:$0x1] %vm400_vm0, %v1385_v0  ;;  %402 = vst.msk [vmem:[#allocation4] sm:$0x1] %vm400_vm0, %v1385_v0 }
  0x13 PF: > { %v410_v1 = vld [vmem:[%s1665_s2 + $0x18] sm:$0xff]  ;;  %v409_v2 = vld [vmem:[%s1665_s2 + $0x10] sm:$0xff]  ;;  %vm418_vm1 = vcmask 261120   ;;  %v1479_v3 = vld [vmem:[%s1464_s23] sm:$0xff]  ;;  %s1386_s16 = smov 16   ;;  %vm535_vm2 = vcmask 523264  }
  0x14   : > { %1204 = vmatprep.subr.mxu1 %v410_v1  ;;  %v408_v4 = vld [vmem:[%s1665_s2 + $0x8] sm:$0xff]  ;;  %1212 = vmatprep.mubr.msk.f32.mxu1 %vm418_vm1, %v1479_v3  ;;  %v407_v5 = vld [vmem:[%s1665_s2] sm:$0xff]  ;;  %v527_v7 = vld [vmem:[%s1667_s4 + $0x38] sm:$0xff]  ;;  %vm698_vm3 = vcmask 130048   ;;  %s1388_s12 = smov [#allocation4]   ;;  %vm968_vm4 = vcmask 0  }
  0x15   : > { %1205 = vmatpush3.msra.mxu1 %v410_v1  ;;  %v1490_v6 = vld [vmem:[%s1464_s23 + $0x8] sm:$0xff]  ;;  %v1496_v8 = vld [vmem:[%s1464_s23 + $0x10] sm:$0xff]  ;;  %v1506_v10 = vld [vmem:[%s1464_s23 + $0x18] sm:$0xff]  ;;  %s1387_s23 = smov 112   ;;  %s1065_s13 = sshll.u32 %s1388_s12, 4  ;;  %s1066_s13 = int_to_ptr.vmem [resolvable:$true] %s1065_s13 }
  0x16   : > { %1206 = vmatprep.subr.mxu1 %v409_v2  ;;  %v526_v9 = vld [vmem:[%s1667_s4 + $0x30] sm:$0xff]  ;;  %v525_v11 = vld [vmem:[%s1667_s4 + $0x28] sm:$0xff]  ;;  %v524_v12 = vld [vmem:[%s1667_s4 + $0x20] sm:$0xff]  ;;  %p1280_p5 = scmp.eq.s32.totalorder %s1456_s18, 1  ;;  %s1389_s14 = smov [#allocation2]  }
  0x17   : > { %1207 = vmatpush3.msra.mxu1 %v409_v2  ;;  %v523_v13 = vld [vmem:[%s1667_s4 + $0x18] sm:$0xff]  ;;  %v522_v14 = vld [vmem:[%s1667_s4 + $0x10] sm:$0xff]  ;;  %v521_v15 = vld [vmem:[%s1667_s4 + $0x8] sm:$0xff]  ;;  %s1054_s15 = sshll.u32 %s1389_s14, 4  ;;  %s1327_s19 = scalar_lea.vmem %s1066_s13, 32  ;;  %s1055_s15 = int_to_ptr.vmem [resolvable:$true] %s1054_s15 }
  0x18   : > { %1208 = vmatprep.subr.mxu1 %v408_v4  ;;  %v520_v16 = vld [vmem:[%s1667_s4] sm:$0xff]  ;;  %v647_v18 = vld [vmem:[%s1469_s26 + $0x10] sm:$0xff]  ;;  %v646_v19 = vld [vmem:[%s1469_s26 + $0x8] sm:$0xff]  ;;  %p1328_p9 = scmp.lt.s32.totalorder %s1066_s13, %s1066_s13 }
  0x19   : > { %1209 = vmatpush3.msra.mxu1 %v408_v4  ;;  %v645_v17 = vld [vmem:[%s1469_s26] sm:$0xff]  ;;  %657 = vrot.lane.b32.xlu1 %v647_v18, %s1386_s16  ;;  %v648_v20 = vld [vmem:[%s1469_s26 + $0x18] sm:$0xff]  ;;  %v690_v50 = vld [vmem:[%s1669_s6 + $0x8] sm:$0xff] }
  0x1a   : > { %1210 = vmatprep.subr.mxu1 %v407_v5  ;;  %653 = vrot.lane.b32.xlu0 %v645_v17, %s1386_s16  ;;  %v1136_v21 = vld [vmem:[%s1666_s3] ss:$0 sm:$0xff] }
  0x1b   : > { %1211 = vmatpush3.msra.mxu1 %v407_v5  ;;  %v1141_v34 = vld [vmem:[%s1668_s5] ss:$0 sm:$0xff]  ;;  %1240 = vmatprep.subr.mxu0 %v690_v50 }
  0x1c   : > { %1213 = vmatmul.mubr.msk.f32.vlgmr.msra.gmra.mxu1 %vm418_vm1, %v1490_v6  ;;  %1218 = vmatprep.subr.mxu1 %v527_v7  ;;  %v689_v53 = vld [vmem:[%s1669_s6] sm:$0xff] }
  0x1d   : > { %1215 = vmatprep.mubr.msk.f32.mxu1 %vm418_vm1, %v1496_v8  ;;  %1219 = vmatpush3.msra.mxu1 %v527_v7 }
  0x1e   : > { %1220 = vmatprep.subr.mxu1 %v526_v9  ;;  %655 = vrot.lane.b32.xlu0 %v646_v19, %s1386_s16 }
  0x1f   : > { %1221 = vmatpush3.msra.mxu1 %v526_v9  ;;  %659 = vrot.lane.b32.xlu1 %v648_v20, %s1386_s16 }
  0x20   : > { %1216 = vmatmul.mubr.msk.f32.gmra.mxu1 %vm418_vm1, %v1506_v10  ;;  %1222 = vmatprep.subr.mxu1 %v525_v11 }
  0x21   : > { %1223 = vmatpush3.msra.mxu1 %v525_v11  ;;  %1241 = vmatpush3.msra.mxu0 %v690_v50 }
  0x22   : > { %1224 = vmatprep.subr.mxu1 %v524_v12  ;;  %1242 = vmatprep.subr.mxu0 %v689_v53 }
  0x23   : > { %1225 = vmatpush3.msra.mxu1 %v524_v12  ;;  %1243 = vmatpush3.msra.mxu0 %v689_v53 }
  0x24   : > { %1226 = vmatprep.subr.mxu1 %v523_v13 }
  0x25   : > { %1227 = vmatpush3.msra.mxu1 %v523_v13 }
  0x26   : > { %1228 = vmatprep.subr.mxu1 %v522_v14 }
  0x27   : > { %1229 = vmatpush3.msra.mxu1 %v522_v14 }
  0x28   : > { %1230 = vmatprep.subr.mxu1 %v521_v15 }
  0x29   : > { %1231 = vmatpush3.msra.mxu1 %v521_v15 }
  0x2a   : > { %1232 = vmatprep.subr.mxu1 %v520_v16 }
  0x2b   : > { %1233 = vmatpush3.msra.mxu1 %v520_v16 }
  0x8b   : > { %v658_v54 = vpop.permute.xlu1 %657 }
  0x8c   : > { %v654_v52 = vpop.permute.xlu0 %653 }
  0x90   : > { %v656_v55 = vpop.permute.xlu0 %655 }
  0x91   : > { %v660_v59 = vpop.permute.xlu1 %659 }
  0xdc   : > { %v1214_v22 = vpop.f32.mrf.mxu1 }
  0xdd   : > { %v503_v23 = vadd.f32 %v1214_v22, %v1136_v21  ;;  %v807_v22 = vld [vmem:[%s1671_s8 + $0x38] sm:$0xff] }
  0xde   : > { %v497_v24 = vpop.f32.mrf.mxu1  ;;  %1250 = vmatprep.subr.mxu0 %v807_v22 }
  0xdf   : > { %v498_v25 = vadd.f32 %v1136_v21, %v497_v24  ;;  %v517_v28 = vmax.f32 %v503_v23, 0.0  ;;  %v806_v23 = vld [vmem:[%s1671_s8 + $0x30] sm:$0xff] }
  0xe0   : > { %v1217_v26 = vpop.f32.mrf.mxu1 }
  0xe1   : > { %v516_v27 = vmax.f32 %v498_v25, 0.0  ;;  %v513_v29 = vadd.f32 %v1217_v26, %v1136_v21 }
  0xe2   : > { %v507_v30 = vpop.f32.mrf.mxu1 }
  0xe3   : > { %v508_v31 = vadd.f32 %v1136_v21, %v507_v30  ;;  %1234 = vmatprep.mubr.msk.f32.mxu1 %vm535_vm2, %v516_v27  ;;  %v519_v33 = vmax.f32 %v513_v29, 0.0  ;;  %v805_v29 = vld [vmem:[%s1671_s8 + $0x28] sm:$0xff] }
  0xe4   : > { %1235 = vmatmul.mubr.msk.f32.vlgmr.msra.gmra.mxu1 %vm535_vm2, %v517_v28 }
  0xe5   : > { %v518_v32 = vmax.f32 %v508_v31, 0.0 }
  0xe7   : > { %1237 = vmatprep.mubr.msk.f32.mxu1 %vm535_vm2, %v518_v32 }
  0xe8   : > { %1238 = vmatmul.mubr.msk.f32.gmra.mxu1 %vm535_vm2, %v519_v33 }
 0x1a4   : > { %v1236_v35 = vpop.f32.mrf.mxu1 }
 0x1a5   : > { %v620_v36 = vadd.f32 %v1236_v35, %v1141_v34  ;;  %v804_v35 = vld [vmem:[%s1671_s8 + $0x20] sm:$0xff] }
 0x1a6   : > { %v614_v37 = vpop.f32.mrf.mxu1 }
 0x1a7   : > { %v634_v38 = vmul.f32 0.5, %v620_v36  ;;  %v1546_v39 = vadd.f32 %v1141_v34, %v614_v37  ;;  %v976_v1 = vmul.f32 %v620_v36, %v620_v36  ;;  %v972_v16 = vadd.f32 1.0, %v620_v36 }
 0x1a8   : > { %v1239_v40 = vpop.f32.mrf.mxu1 }
 0x1a9   : > { %v639_v41 = vmul.f32 1.442695, %v634_v38  ;;  %v633_v42 = vmul.f32 0.5, %v1546_v39  ;;  %v1549_v43 = vadd.f32 %v1239_v40, %v1141_v34  ;;  %v975_v2 = vmul.f32 %v1546_v39, %v1546_v39 }
 0x1aa   : > { %v624_v44 = vpop.f32.mrf.mxu1  ;;  %v971_v21 = vadd.f32 1.0, %v1546_v39 }
 0x1ab   : > { %1297 = vpow2.f32 %v639_v41  ;;  %v637_v45 = vmul.f32 1.442695, %v633_v42  ;;  %v636_v46 = vmul.f32 0.5, %v1549_v43  ;;  %v1552_v47 = vadd.f32 %v1141_v34, %v624_v44  ;;  %v803_v41 = vld [vmem:[%s1671_s8 + $0x18] sm:$0xff]  ;;  %v802_v42 = vld [vmem:[%s1671_s8 + $0x10] sm:$0xff]  ;;  %v800_v44 = vld [vmem:[%s1671_s8] sm:$0xff] }
 0x1ac   : > { %v978_v4 = vmul.f32 %v1549_v43, %v1549_v43  ;;  %v974_v28 = vadd.f32 1.0, %v1549_v43 }
 0x1ad   : > { %1299 = vpow2.f32 %v637_v45  ;;  %v643_v48 = vmul.f32 1.442695, %v636_v46  ;;  %v635_v49 = vmul.f32 0.5, %v1552_v47  ;;  %v977_v5 = vmul.f32 %v1552_v47, %v1552_v47 }
 0x1ae   : > { %v973_v34 = vadd.f32 1.0, %v1552_v47 }
 0x1af   : > { %1301 = vpow2.f32 %v643_v48  ;;  %v641_v51 = vmul.f32 1.442695, %v635_v49 }
 0x1b1   : > { %1303 = vpow2.f32 %v641_v51  ;;  %v1146_v51 = vld [vmem:[%s1670_s7] ss:$0 sm:$0xff] }
 0x1b8   : > { %v1298_v56 = vpop.eup %1297 }
 0x1b9   : > { %v666_v57 = vmul.f32 %v1298_v56, %v656_v55  ;;  %v1000_v19 = vmul.f32 %v1298_v56, %v1298_v56 }
 0x1ba   : > { %v1300_v58 = vpop.eup %1299 }
 0x1bb   : > { %v665_v60 = vmul.f32 %v1300_v58, %v654_v52  ;;  %675 = vrot.lane.b32.xlu1 %v666_v57, %s1387_s23  ;;  %v999_v26 = vmul.f32 %v1300_v58, %v1300_v58 }
 0x1bc   : > { %v1302_v61 = vpop.eup %1301 }
 0x1bd   : > { %v668_v62 = vmul.f32 %v1302_v61, %v660_v59  ;;  %673 = vrot.lane.b32.xlu0 %v665_v60, %s1387_s23  ;;  %v1002_v32 = vmul.f32 %v1302_v61, %v1302_v61 }
 0x1be   : > { %v1304_v63 = vpop.eup %1303 }
 0x1bf   : > { %v667_v0 = vmul.f32 %v1304_v63, %v658_v54  ;;  %679 = vrot.lane.b32.xlu1 %v668_v62, %s1387_s23  ;;  %v1001_v38 = vmul.f32 %v1304_v63, %v1304_v63 }
 0x1c1   : > { %677 = vrot.lane.b32.xlu0 %v667_v0, %s1387_s23  ;;  %v1151_v0 = vld [vmem:[%s1672_s9] ss:$0 sm:$0xff] }
 0x1c3   : > { %985 = vrot.lane.b32.xlu1 %v976_v1, %s1386_s16 }
 0x1c5   : > { %983 = vrot.lane.b32.xlu0 %v975_v2, %s1386_s16 }
 0x1c7   : > { %989 = vrot.lane.b32.xlu1 %v978_v4, %s1386_s16 }
 0x1c9   : > { %987 = vrot.lane.b32.xlu0 %v977_v5, %s1386_s16  ;;  %s1321_s16 = scalar_lea.vmem %s1066_s13, 16 }
 0x1ca   : > { %p1322_p6 = scmp.ne.s32.totalorder %s1066_s13, %s1321_s16  ;;  %p1329_p10 = scmp.lt.s32.totalorder %s1327_s19, %s1321_s16 }
 0x1cc   : > { %p1323_p7 = pnand %p1322_p6, %p1280_p5  ;;  %p1330_p11 = por %p1329_p10, %p1328_p9 }
 0x1ce   : > { %p1324_p8 = pneg %p1323_p7 }
 0x1d0   : > { %p1331_p12 = pnand %p1330_p11, %p1324_p8 }
 0x22d   : > { %v676_v7 = vpop.permute.xlu1 %675 }
 0x22e   : > { %v686_v12 = vadd.f32 %v676_v7, %v620_v36 }
 0x22f   : > { %v674_v9 = vpop.permute.xlu0 %673 }
 0x230   : > { %v685_v11 = vadd.f32 %v674_v9, %v1546_v39 }
 0x231   : > { %v680_v13 = vpop.permute.xlu1 %679 }
 0x232   : > { %1244 = vmatprep.mubr.msk.f32.mxu0 %vm698_vm3, %v685_v11  ;;  %v688_v17 = vadd.f32 %v680_v13, %v1549_v43  ;;  %v801_v43 = vld [vmem:[%s1671_s8 + $0x8] sm:$0xff] }
 0x233   : > { %1245 = vmatmul.mubr.msk.f32.vlgmr.msra.gmra.mxu0 %vm698_vm3, %v686_v12  ;;  %v678_v14 = vpop.permute.xlu0 %677 }
 0x234   : > { %v687_v15 = vadd.f32 %v678_v14, %v1552_v47  ;;  %1251 = vmatpush3.msra.mxu0 %v807_v22 }
 0x235   : > { %v986_v18 = vpop.permute.xlu1 %985  ;;  %1252 = vmatprep.subr.mxu0 %v806_v23 }
 0x236   : > { %v996_v20 = vsub.f32 %v972_v16, %v986_v18  ;;  %1247 = vmatprep.mubr.msk.f32.mxu0 %vm698_vm3, %v687_v15  ;;  %1253 = vmatpush3.msra.mxu0 %v806_v23 }
 0x237   : > { %1248 = vmatmul.mubr.msk.f32.gmra.mxu0 %vm698_vm3, %v688_v17  ;;  %v984_v24 = vpop.permute.xlu0 %983  ;;  %1254 = vmatprep.subr.mxu0 %v805_v29 }
 0x238   : > { %v1004_v25 = vsub.f32 %v996_v20, %v1000_v19  ;;  %v995_v27 = vsub.f32 %v971_v21, %v984_v24  ;;  %1255 = vmatpush3.msra.mxu0 %v805_v29 }
 0x239   : > { %v990_v30 = vpop.permute.xlu1 %989  ;;  %1256 = vmatprep.subr.mxu0 %v804_v35 }
 0x23a   : > { %v1003_v31 = vsub.f32 %v995_v27, %v999_v26  ;;  %v998_v33 = vsub.f32 %v974_v28, %v990_v30  ;;  %1013 = vrot.lane.b32.xlu1 %v1004_v25, %s1387_s23  ;;  %1257 = vmatpush3.msra.mxu0 %v804_v35 }
 0x23b   : > { %v988_v36 = vpop.permute.xlu0 %987  ;;  %1258 = vmatprep.subr.mxu0 %v803_v41 }
 0x23c   : > { %v1006_v37 = vsub.f32 %v998_v33, %v1002_v32  ;;  %v997_v39 = vsub.f32 %v973_v34, %v988_v36  ;;  %1011 = vrot.lane.b32.xlu0 %v1003_v31, %s1387_s23  ;;  %1259 = vmatpush3.msra.mxu0 %v803_v41 }
 0x23d   : > { %1260 = vmatprep.subr.mxu0 %v802_v42 }
 0x23e   : > { %v1005_v40 = vsub.f32 %v997_v39, %v1001_v38  ;;  %1017 = vrot.lane.b32.xlu1 %v1006_v37, %s1387_s23  ;;  %1261 = vmatpush3.msra.mxu0 %v802_v42 }
 0x23f   : > { %1262 = vmatprep.subr.mxu0 %v801_v43 }
 0x240   : > { %1015 = vrot.lane.b32.xlu0 %v1005_v40, %s1387_s23  ;;  %1263 = vmatpush3.msra.mxu0 %v801_v43 }
 0x241   : > { %1264 = vmatprep.subr.mxu0 %v800_v44 }
 0x242   : > { %1265 = vmatpush3.msra.mxu0 %v800_v44 }
 0x2ac   : > { %v1014_v45 = vpop.permute.xlu1 %1013 }
 0x2ad   : > { %v1026_v46 = vsel %vm698_vm3, %v1014_v45, 0.0 }
 0x2ae   : > { %1027 = vadd.xlane.f32.xlu0 %v1026_v46  ;;  %v1012_v47 = vpop.permute.xlu0 %1011 }
 0x2af   : > { %v1023_v48 = vsel %vm698_vm3, %v1012_v47, 0.0 }
 0x2b0   : > { %v1018_v37 = vpop.permute.xlu1 %1017 }
 0x2b1   : > { %v1032_v39 = vsel %vm698_vm3, %v1018_v37, 0.0 }
 0x2b2   : > { %1024 = vadd.xlane.f32.xlu0 %v1023_v48  ;;  %v1016_v49 = vpop.permute.xlu0 %1015 }
 0x2b3   : > { %v1029_v50 = vsel %vm698_vm3, %v1016_v49, 0.0 }
 0x2b6   : > { %1030 = vadd.xlane.f32.xlu0 %v1029_v50 }
 0x2f3   : > { %v1246_v52 = vpop.f32.mrf.mxu0 }
 0x2f4   : > { %v783_v53 = vadd.f32 %v1246_v52, %v1146_v51 }
 0x2f5   : > { %v777_v54 = vpop.f32.mrf.mxu0 }
 0x2f6   : > { %v778_v55 = vadd.f32 %v1146_v51, %v777_v54  ;;  %v797_v58 = vmax.f32 %v783_v53, 0.0 }
 0x2f7   : > { %v1249_v56 = vpop.f32.mrf.mxu0 }
 0x2f8   : > { %v796_v57 = vmax.f32 %v778_v55, 0.0  ;;  %v793_v59 = vadd.f32 %v1249_v56, %v1146_v51 }
 0x2f9   : > { %v787_v60 = vpop.f32.mrf.mxu0 }
 0x2fa   : > { %v788_v61 = vadd.f32 %v1146_v51, %v787_v60  ;;  %1266 = vmatprep.mubr.msk.f32.mxu0 %vm535_vm2, %v796_v57  ;;  %v799_v63 = vmax.f32 %v793_v59, 0.0 }
 0x2fb   : > { %1267 = vmatmul.mubr.msk.f32.vlgmr.msra.gmra.mxu0 %vm535_vm2, %v797_v58 }
 0x2fc   : > { %v798_v62 = vmax.f32 %v788_v61, 0.0 }
 0x2fe   : > { %1269 = vmatprep.mubr.msk.f32.mxu0 %vm535_vm2, %v798_v62 }
 0x2ff   : > { %1270 = vmatmul.mubr.msk.f32.gmra.mxu0 %vm535_vm2, %v799_v63  ;;  %v970_v63 = vld [vmem:[#allocation4] sm:$0x1] }
 0x337   : > { %v1028_v41 = vpop.xlane.xlu0 %1027 }
 0x33b   : > { %v1025_v42 = vpop.xlane.xlu0 %1024 }
 0x33c   : > { %v1035_v45 = vadd.f32 %v1028_v41, %v1025_v42 }
 0x33f   : > { %v1031_v43 = vpop.xlane.xlu0 %1030 }
 0x3bb   : > { %v1268_v1 = vpop.f32.mrf.mxu0 }
 0x3bc   : > { %v899_v2 = vadd.f32 %v1268_v1, %v1151_v0 }
 0x3bd   : > { %v893_v4 = vpop.f32.mrf.mxu0 }
 0x3be   : > { %v1157_v5 = vmul.f32 -1.442695, %v899_v2  ;;  %v894_v7 = vadd.f32 %v1151_v0, %v893_v4 }
 0x3bf   : > { %v1271_v9 = vpop.f32.mrf.mxu0 }
 0x3c0   : > { %1305 = vpow2.f32 %v1157_v5  ;;  %v1156_v11 = vmul.f32 -1.442695, %v894_v7  ;;  %v909_v12 = vadd.f32 %v1271_v9, %v1151_v0  ;;  %v936_v5 = vld [vmem:[#allocation2] sm:$0x1] }
 0x3c1   : > { %v903_v13 = vpop.f32.mrf.mxu0 }
 0x3c2   : > { %1307 = vpow2.f32 %v1156_v11  ;;  %v1159_v14 = vmul.f32 -1.442695, %v909_v12  ;;  %v904_v15 = vadd.f32 %v1151_v0, %v903_v13 }
 0x3c4   : > { %1309 = vpow2.f32 %v1159_v14  ;;  %v1158_v16 = vmul.f32 -1.442695, %v904_v15 }
 0x3c6   : > { %1311 = vpow2.f32 %v1158_v16 }
 0x3cd   : > { %v1306_v17 = vpop.eup %1305 }
 0x3ce   : > { %v925_v18 = vadd.f32 1.0, %v1306_v17 }
 0x3cf   : > { %v1308_v19 = vpop.eup %1307 }
 0x3d0   : > { %1313 = vrcp.f32 %v925_v18  ;;  %v924_v20 = vadd.f32 1.0, %v1308_v19 }
 0x3d1   : > { %v1310_v21 = vpop.eup %1309 }
 0x3d2   : > { %1315 = vrcp.f32 %v924_v20  ;;  %v927_v22 = vadd.f32 1.0, %v1310_v21 }
 0x3d3   : > { %v1312_v23 = vpop.eup %1311 }
 0x3d4   : > { %1317 = vrcp.f32 %v927_v22  ;;  %v926_v24 = vadd.f32 1.0, %v1312_v23 }
 0x3d6   : > { %1319 = vrcp.f32 %v926_v24 }
 0x3dd   : > { %v1314_v25 = vpop.eup %1313 }
 0x3de   : > { %v938_v26 = vsub.f32 %v1490_v6, %v1314_v25 }
 0x3df   : > { %v1316_v27 = vpop.eup %1315 }
 0x3e0   : > { %v942_v28 = vmul.f32 %v938_v26, %v938_v26  ;;  %v937_v29 = vsub.f32 %v1479_v3, %v1316_v27 }
 0x3e1   : > { %v1318_v30 = vpop.eup %1317 }
 0x3e2   : > { %v948_v31 = vsel %vm418_vm1, %v942_v28, 0.0  ;;  %v941_v32 = vmul.f32 %v937_v29, %v937_v29  ;;  %v940_v36 = vsub.f32 %v1506_v10, %v1318_v30  ;;  %v1036_v10 = vadd.f32 %v1035_v45, %v1031_v43 }
 0x3e3   : > { %v1320_v33 = vpop.eup %1319  ;;  %949 = vadd.xlane.f32.xlu1 %v948_v31 }
 0x3e4   : > { %v945_v34 = vsel %vm418_vm1, %v941_v32, 0.0  ;;  %v939_v35 = vsub.f32 %v1496_v8, %v1320_v33  ;;  %v944_v3 = vmul.f32 %v940_v36, %v940_v36 }
 0x3e5   : > { %946 = vadd.xlane.f32.xlu0 %v945_v34 }
 0x3e6   : > { %v943_v38 = vmul.f32 %v939_v35, %v939_v35  ;;  %v954_v40 = vsel %vm418_vm1, %v944_v3, 0.0 }
 0x3e8   : > { %v951_v6 = vsel %vm418_vm1, %v943_v38, 0.0 }
 0x3e9   : > { %952 = vadd.xlane.f32.xlu1 %v951_v6  ;;  %1033 = vadd.xlane.f32.xlu0 %v1032_v39 }
 0x3ed   : > { %955 = vadd.xlane.f32.xlu1 %v954_v40 }
 0x46c   : > { %v950_v44 = vpop.xlane.xlu1 %949 }
 0x46e   : > { %v947_v8 = vpop.xlane.xlu0 %946 }
 0x46f   : > { %v957_v48 = vadd.f32 %v950_v44, %v947_v8 }
 0x472   : > { %v953_v46 = vpop.xlane.xlu1 %952  ;;  %v1034_v47 = vpop.xlane.xlu0 %1033 }
 0x473   : > { %v1037_v49 = vadd.f32 %v1036_v10, %v1034_v47  ;;  %v958_v50 = vadd.f32 %v957_v48, %v953_v46 }
 0x475   : > { %v1038_v51 = vrot.slane %v1037_v49, 4 }
 0x476   : > { %v956_v52 = vpop.xlane.xlu1 %955 }
 0x477   : > { %v1039_v53 = vadd.f32 %v1038_v51, %v1037_v49  ;;  %v959_v54 = vadd.f32 %v958_v50, %v956_v52 }
 0x479   : > { %v1040_v55 = vrot.slane %v1039_v53, 2  ;;  %v960_v56 = vrot.slane %v959_v54, 4 }
 0x47b   : > { %v1041_v57 = vadd.f32 %v1040_v55, %v1039_v53  ;;  %v961_v58 = vadd.f32 %v960_v56, %v959_v54 }
 0x47d   : > { %v1042_v59 = vrot.slane %v1041_v57, 1  ;;  %v962_v60 = vrot.slane %v961_v58, 2 }
 0x47f   : > { %v1043_v61 = vadd.f32 %v1042_v59, %v1041_v57  ;;  %v963_v62 = vadd.f32 %v962_v60, %v961_v58 }
 0x481   : > { %v964_v0 = vrot.slane %v963_v62, 1  ;;  %v1044_v1 = vmul.f32 0.5, %v1043_v61 }
 0x483   : > { %v965_v2 = vadd.f32 %v964_v0, %v963_v62  ;;  %v1045_v4 = vadd.f32 %v1044_v1, %v970_v63 }
 0x485   : > { %v966_v7 = vmul.f32 -0.5, %v965_v2  ;;  %1046 = vst.msk [vmem:[#allocation4] sm:$0x1] %vm968_vm4, %v1045_v4 }
 0x486   : > { %1334 = shalt.err (!%p1331_p12)
}
 0x487   : > { %1275 = dma.vmem_to_hbm [thread:$0]  (%p1280_p5), %s1066_s13, 16, %s1674_s11, [#allocation5]   ;;  %v967_v9 = vadd.f32 %v966_v7, %v936_v5 }
 0x488   : > { %s1345_s21 = scalar_lea.vmem %s1055_s15, 16  ;;  %s1351_s22 = scalar_lea.vmem %s1055_s15, 32 }
 0x489   : > { %969 = vst.msk [vmem:[#allocation2] sm:$0x1] %vm968_vm4, %v967_v9  ;;  %p1346_p13 = scmp.ne.s32.totalorder %s1055_s15, %s1345_s21  ;;  %p1352_p2 = scmp.lt.s32.totalorder %s1055_s15, %s1055_s15 }
 0x48a   : > { %p1353_p3 = scmp.lt.s32.totalorder %s1351_s22, %s1345_s21 }
 0x48b   : > { %p1347_p0 = pnand %p1346_p13, %p1280_p5 }
 0x48c   : > { %p1354_p4 = por %p1353_p3, %p1352_p2 }
 0x48d   : > { %p1348_p1 = pneg %p1347_p0 }
 0x48f   : > { %p1355_p6 = pnand %p1354_p4, %p1348_p1 }
 0x491   : > { %1358 = shalt.err (!%p1355_p6)
}
 0x492   : > { %1273 = dma.vmem_to_hbm [thread:$0]  (%p1280_p5), %s1055_s15, 16, %s1673_s10, [#allocation3]  }
 0x493   : > { %1374 = dma.done.wait (%p1280_p5), [#allocation3], 16  }
 0x494   : > { %1376 = vsyncadd (%p1280_p5), [#allocation3], 4294967280 }
 0x495   : > { %1378 = dma.done.wait (%p1280_p5), [#allocation5], 16  }
 0x496   : > { %1380 = vsyncadd (%p1280_p5), [#allocation5], 4294967280 }
 0x497 PF: > { %s24_s17 = sadd.s32 1, %s1383_s17  }
 0x498   : > { %p21_p7 = scmp.ge.s32.totalorder %s24_s17, 4  }
 0x49a   :  { %23 = sbr.rel (!%p21_p7) target bundleno = 2 (0x2), region = 102 }
 0x49f   :  { %1082 = vsyncpa [#allocation3], 1 }
 0x4a0   :  { %1084 = vsyncpa [#allocation3 + $0x1], 1 }
 0x4a1   :  { %1085 = vsyncpa [#allocation5], 1 }

</bundles_post_ra>
